<compile_context>
chip_gen: v6e
topology: v6e:2x2x1
jax: 0.10.0
libtpu: 0.0.40
codegen_flags: <defaults>
</compile_context>

<pallas_src>
import jax
import jax.numpy as jnp
from jax.experimental import pallas as pl
from jax.experimental.pallas import tpu as pltpu


_LANES = 512      # lane-dense slab width (multiple of 128 -> unmasked vst)
_ROW_TILE = 512   # 512 x 512 f32 = 1 MiB per array per block


def _sigmoid_ce_kernel(x_ref, z_ref, o_ref):
    """Element-wise sigmoid cross entropy with logits on one VMEM block."""
    x = x_ref[...]
    z = z_ref[...]
    # max(x, 0) - x*z + log(1 + exp(-|x|)).
    # exp(-|x|) <= 1, so the plain-log formulation is overflow-free and agrees
    # with torch's log1p form to < 2^-24 absolute (exp/log run on the EUP).
    softplus_neg_abs = jnp.log(1.0 + jnp.exp(-jnp.abs(x)))
    o_ref[...] = jnp.maximum(x, 0.0) - x * z + softplus_neg_abs


def sigmoid_cross_entropy_with_logits(logits, targets):
    """Pallas TPU element-wise sigmoid CE with logits (any shape)."""
    x = jnp.asarray(logits, jnp.float32)
    z = jnp.asarray(targets, jnp.float32)
    assert x.shape == z.shape
    orig_shape = x.shape
    n = x.size

    # Flatten to a lane-dense (rows, _LANES) slab.  Pure row-major reshape
    # (no transpose glue); zero-padding (if any) only touches the tail block
    # and is sliced off afterwards.
    rows = pl.cdiv(n, _LANES)
    if rows <= _ROW_TILE:
        row_tile = max(rows, 1)      # single grid step for small problems
        rows_padded = row_tile
    else:
        row_tile = _ROW_TILE
        rows_padded = pl.cdiv(rows, _ROW_TILE) * _ROW_TILE
    padded = rows_padded * _LANES

    xf = x.reshape(-1)
    zf = z.reshape(-1)
    if padded != n:
        xf = jnp.pad(xf, (0, padded - n))
        zf = jnp.pad(zf, (0, padded - n))
    x2 = xf.reshape(rows_padded, _LANES)
    z2 = zf.reshape(rows_padded, _LANES)

    out = pl.pallas_call(
        _sigmoid_ce_kernel,
        out_shape=jax.ShapeDtypeStruct((rows_padded, _LANES), jnp.float32),
        grid=(rows_padded // row_tile,),
        in_specs=[
            pl.BlockSpec((row_tile, _LANES), lambda i: (i, 0)),
            pl.BlockSpec((row_tile, _LANES), lambda i: (i, 0)),
        ],
        out_specs=pl.BlockSpec((row_tile, _LANES), lambda i: (i, 0)),
        compiler_params=pltpu.CompilerParams(
            dimension_semantics=("parallel",)),
    )(x2, z2)

    return out.reshape(-1)[:n].reshape(orig_shape)


def weighted_cross_entropy_loss_ver1(inputs, targets, weights, reduction="none"):
    """Forward pass of WeightedCrossEntropyLoss_ver1.

    Args:
      inputs:  (B, #anchors, #classes) predicted logits.
      targets: (B, #anchors, #classes) one-hot classification targets.
      weights: (B, #anchors) anchor-wise weights.  Kept for signature fidelity;
        the original PyTorch forward never applies them.
      reduction: 'none' (default) | 'sum' | 'mean' over the class axis.
    """
    del weights  # unused, exactly like the reference module
    loss = sigmoid_cross_entropy_with_logits(inputs, targets)
    if reduction == "none":
        return loss
    elif reduction == "sum":
        return jnp.sum(loss, axis=-1)   # tiny class-axis reduce, left to XLA
    elif reduction == "mean":
        return jnp.mean(loss, axis=-1)
    return loss


def _reference(inputs, targets, reduction="none"):
    x = inputs.astype(jnp.float32)
    z = targets.astype(jnp.float32)
    loss = jnp.maximum(x, 0.0) - x * z + jnp.log1p(jnp.exp(-jnp.abs(x)))
    if reduction == "sum":
        return jnp.sum(loss, axis=-1)
    if reduction == "mean":
        return jnp.mean(loss, axis=-1)
    return loss


if __name__ == "__main__":
    key = jax.random.PRNGKey(0)
    k1, k2, k3, k4, k5 = jax.random.split(key, 5)

    # Small case (single grid step).
    B, A, C = 2, 8, 4
    logits = jax.random.normal(k1, (B, A, C), dtype=jnp.float32) * 3.0
    cls = jax.random.randint(k2, (B, A), 0, C)
    target = jax.nn.one_hot(cls, C, dtype=jnp.float32)
    weights = jax.random.uniform(k3, (B, A), dtype=jnp.float32)

    loss = jax.block_until_ready(
        weighted_cross_entropy_loss_ver1(logits, target, weights))
    assert loss.shape == (B, A, C)
    assert jnp.allclose(loss, _reference(logits, target), atol=1e-5, rtol=1e-5)

    loss_sum = jax.block_until_ready(
        weighted_cross_entropy_loss_ver1(logits, target, weights,
                                         reduction="sum"))
    assert loss_sum.shape == (B, A)
    assert jnp.allclose(loss_sum, _reference(logits, target, "sum"),
                        atol=1e-5, rtol=1e-5)

    # Larger case that exercises the tiled, multi-grid-step path.
    B2, A2, C2 = 2, 40000, 4
    logits2 = jax.random.normal(k4, (B2, A2, C2), dtype=jnp.float32) * 3.0
    cls2 = jax.random.randint(k5, (B2, A2), 0, C2)
    target2 = jax.nn.one_hot(cls2, C2, dtype=jnp.float32)
    weights2 = jnp.ones((B2, A2), jnp.float32)

    loss2 = jax.block_until_ready(
        weighted_cross_entropy_loss_ver1(logits2, target2, weights2))
    assert loss2.shape == (B2, A2, C2)
    assert jnp.allclose(loss2, _reference(logits2, target2),
                        atol=1e-5, rtol=1e-5)

    print("KERNEL_OK")
</pallas_src>

<mosaic_0001>
module attributes {stable_mosaic.version = 11 : i64} {
  func.func @_sigmoid_ce_kernel(%arg0: i32, %arg1: memref<1x512xf32, #tpu.memory_space<vmem>>, %arg2: memref<1x512xf32, #tpu.memory_space<vmem>>, %arg3: memref<1x512xf32, #tpu.memory_space<vmem>>) attributes {dimension_semantics = [#tpu.dimension_semantics<parallel>], iteration_bounds = array<i64: 1>, scalar_prefetch = 0 : i64, scratch_operands = 0 : i64, tpu.core_type = #tpu.core_type<tc>, window_params = [{transform_indices = @transform_0, window_bounds = array<i64: 1, 512>}, {transform_indices = @transform_1, window_bounds = array<i64: 1, 512>}, {transform_indices = @transform_2, window_bounds = array<i64: 1, 512>}]} {
    %c0 = arith.constant 0 : index
    %c0_0 = arith.constant 0 : index
    %0 = vector.load %arg1[%c0, %c0_0] : memref<1x512xf32, #tpu.memory_space<vmem>>, vector<1x512xf32>
    %c0_1 = arith.constant 0 : index
    %c0_2 = arith.constant 0 : index
    %1 = vector.load %arg2[%c0_1, %c0_2] : memref<1x512xf32, #tpu.memory_space<vmem>>, vector<1x512xf32>
    %2 = math.absf %0 : vector<1x512xf32>
    %cst = arith.constant 0.000000e+00 : f32
    %3 = vector.broadcast %cst : f32 to vector<1x512xf32>
    %4 = arith.subf %3, %2 : vector<1x512xf32>
    %5 = math.exp %4 : vector<1x512xf32>
    %cst_3 = arith.constant 1.000000e+00 : f32
    %6 = vector.broadcast %cst_3 : f32 to vector<1x512xf32>
    %7 = arith.addf %6, %5 : vector<1x512xf32>
    %8 = math.log %7 : vector<1x512xf32>
    %cst_4 = arith.constant 0.000000e+00 : f32
    %9 = vector.broadcast %cst_4 : f32 to vector<1x512xf32>
    %10 = arith.maximumf %0, %9 : vector<1x512xf32>
    %11 = arith.mulf %0, %1 : vector<1x512xf32>
    %12 = arith.subf %10, %11 : vector<1x512xf32>
    %13 = arith.addf %12, %8 : vector<1x512xf32>
    %c0_5 = arith.constant 0 : index
    %c0_6 = arith.constant 0 : index
    %14 = vector.load %arg3[%c0_5, %c0_6] : memref<1x512xf32, #tpu.memory_space<vmem>>, vector<1x512xf32>
    tpu.vector_store %arg3[%c0_5, %c0_6], %13 {strides = array<i32>} : memref<1x512xf32, #tpu.memory_space<vmem>>, vector<1x512xf32>,
    return
  }
  func.func @transform_0(%arg0: i32) -> (i32, i32) {
    %c0_i32 = arith.constant 0 : i32
    %c0_i32_0 = arith.constant 0 : i32
    return %arg0, %c0_i32 : i32, i32
  }
  func.func @transform_1(%arg0: i32) -> (i32, i32) {
    %c0_i32 = arith.constant 0 : i32
    %c0_i32_0 = arith.constant 0 : i32
    return %arg0, %c0_i32 : i32, i32
  }
  func.func @transform_2(%arg0: i32) -> (i32, i32) {
    %c0_i32 = arith.constant 0 : i32
    %c0_i32_0 = arith.constant 0 : i32
    return %arg0, %c0_i32 : i32, i32
  }
}

</mosaic_0001>

<bundles_post_ra>
// kernel: tpu_custom_call.1
= control target key start
LH: loop header
LB: loop body
LE: loop exit
PB: predicated region body
PF: predicated region fallthrough
CT: control target
= control target key end

     0   :  { %7 = vsyncpa [#allocation3], 0  ;;  %s170_s0 = inlined_call_operand.hbm [shape: f32[1,512], index: 0, kind: input, shape index: {}]   ;;  %s171_s1 = inlined_call_operand.hbm [shape: f32[1,512], index: 1, kind: input, shape index: {}]   ;;  %s172_s2 = inlined_call_operand.hbm [shape: f32[1,512], index: 2, kind: output, shape index: {}]  }
   0x1   :  { %8 = vsyncpa [#allocation6], 0 }
   0x2   :  { %9 = vsyncpa [#allocation4], 0  ;;  %s143_s9 = smov [#allocation2]   ;;  %s144_s11 = smov [#allocation5]  }
   0x3   :  { %s16_s10 = sshll.u32 %s143_s9, 4  ;;  %s26_s12 = sshll.u32 %s144_s11, 4  ;;  %s17_s10 = int_to_ptr.vmem [resolvable:$true] %s16_s10  ;;  %s27_s12 = int_to_ptr.vmem [resolvable:$true] %s26_s12 }
   0x4   :  { %s85_s13 = scalar_lea.vmem %s17_s10, 64  ;;  %p90_p1 = scmp.lt.s32.totalorder %s17_s10, %s17_s10 }
   0x5   :  { %p86_p0 = scmp.ne.s32.totalorder %s17_s10, %s85_s13  ;;  %p91_p2 = scmp.lt.s32.totalorder %s85_s13, %s85_s13 }
   0x7   :  { %p92_p3 = por %p91_p2, %p90_p1 }
   0x9   :  { %p93_p4 = pnand %p92_p3, %p86_p0 }
   0xb   :  { %96 = shalt.err (!%p93_p4)
}
   0xc   :  { %19 = dma.hbm_to_vmem [thread:$0]  %s170_s0, 64, %s17_s10, [#allocation3]  }
   0xd   :  { %s105_s16 = scalar_lea.vmem %s27_s12, 64  ;;  %p110_p6 = scmp.lt.s32.totalorder %s27_s12, %s27_s12 }
   0xe   :  { %p106_p5 = scmp.ne.s32.totalorder %s27_s12, %s105_s16  ;;  %p111_p7 = scmp.lt.s32.totalorder %s105_s16, %s105_s16 }
  0x10   :  { %p112_p8 = por %p111_p7, %p110_p6 }
  0x12   :  { %p113_p9 = pnand %p112_p8, %p106_p5 }
  0x14   :  { %116 = shalt.err (!%p113_p9)
}
  0x15   :  { %29 = dma.hbm_to_vmem [thread:$0]  %s171_s1, 64, %s27_s12, [#allocation6]  }
  0x16   :  { %137 = dma.done.wait [#allocation3], 64  }
  0x17   :  { %138 = vsyncadd [#allocation3], 4294967232 }
  0x18   :  { %139 = dma.done.wait [#allocation6], 64  }
  0x19   :  { %140 = vsyncadd [#allocation6], 4294967232  ;;  %v36_v0 = vld [vmem:[#allocation2] sm:$0xf]  ;;  %v37_v6 = vld [vmem:[#allocation5] sm:$0xf]  ;;  %v49_v9 = vlaneseq }
  0x1a   :  { %v38_v1 = vand.u32 2147483647, %v36_v0  ;;  %v45_v7 = vmax.f32 %v36_v0, 0.0  ;;  %v46_v8 = vmul.f32 %v37_v6, %v36_v0  ;;  %s145_s0 = smov [#allocation7]  }
  0x1b   :  { %s60_s1 = sshll.u32 %s145_s0, 4  ;;  %vm51_vm0 = vcmp.lt.s32.totalorder %v49_v9, 512  ;;  %s61_s1 = int_to_ptr.vmem [resolvable:$true] %s60_s1 }
  0x1c   :  { %v39_v2 = vsub.f32 0.0, %v38_v1  ;;  %v47_v10 = vsub.f32 %v45_v7, %v46_v8  ;;  %s117_s19 = scalar_lea.vmem %s61_s1, 64  ;;  %p122_p11 = scmp.lt.s32.totalorder %s61_s1, %s61_s1 }
  0x1d   :  { %p118_p10 = scmp.ne.s32.totalorder %s61_s1, %s117_s19  ;;  %p123_p12 = scmp.lt.s32.totalorder %s117_s19, %s117_s19 }
  0x1e   :  { %v40_v3 = vmul.f32 1.442695, %v39_v2 }
  0x1f   :  { %p124_p13 = por %p123_p12, %p122_p11 }
  0x20   :  { %73 = vpow2.f32 %v40_v3 }
  0x21   :  { %p125_p0 = pnand %p124_p13, %p118_p10 }
  0x2d   :  { %v74_v4 = vpop.eup %73 }
  0x2e   :  { %v42_v5 = vadd.f32 1.0, %v74_v4 }
  0x30   :  { %75 = vlog2.f32 %v42_v5 }
  0x3d   :  { %v76_v11 = vpop.eup %75 }
  0x3e   :  { %v44_v12 = vmul.f32 0.6931472, %v76_v11 }
  0x40   :  { %v48_v13 = vadd.f32 %v47_v10, %v44_v12 }
  0x42   :  { %53 = vst.msk [vmem:[#allocation7] sm:$0xf] %vm51_vm0, %v48_v13 }
  0x43   :  { %128 = shalt.err (!%p125_p0)
}
  0x44   :  { %63 = dma.vmem_to_hbm [thread:$0]  %s61_s1, 64, %s172_s2, [#allocation4]  }
  0x45   :  { %141 = dma.done.wait [#allocation4], 64  }
  0x46   :  { %142 = vsyncadd [#allocation4], 4294967232 }
  0x47   :  { %67 = vsyncpa [#allocation3], 1 }
  0x48   :  { %68 = vsyncpa [#allocation6], 1 }
  0x49   :  { %69 = vsyncpa [#allocation4], 1 }

</bundles_post_ra>
